<compile_context>
chip_gen: v7x
topology: tpu7x:2x2x1
jax: 0.10.0
libtpu: 0.0.40
codegen_flags: <defaults>
</compile_context>

<pallas_src>
import jax
import jax.numpy as jnp
from jax import lax
from jax.experimental import pallas as pl
from jax.experimental.pallas import tpu as pltpu


def _decoder_kernel(x_ref, h0_ref, c0_ref,
                    wih_t_ref, whh_t_ref, b_ref,
                    wfc_t_ref, bfc_ref,
                    y_ref, h_out_ref, c_out_ref,
                    gates_ref, hseq_ref, h_carry_ref, c_carry_ref):
    """One (batch_block, time_chunk) grid step of the LSTM + FC head.

    x_ref:       (Tc, Bb, D)   time-major input chunk (batch padded to 8k)
    h0_ref:      (Bb, E)       initial hidden for this batch block
    c0_ref:      (Bb, E)       initial cell   for this batch block
    wih_t_ref:   (D, 4E)       W_ih^T, gate order (i, f, o, g)
    whh_t_ref:   (E, 4E)       W_hh^T, gate order (i, f, o, g)
    b_ref:       (1, 4E)       b_ih + b_hh,  gate order (i, f, o, g)
    wfc_t_ref:   (E, D)        W_fc^T
    bfc_ref:     (1, D)        b_fc
    y_ref:       (Tc, Bb, D)   fc(output) chunk
    h_out_ref:   (Bb, E)       final hidden (written on last chunk)
    c_out_ref:   (Bb, E)       final cell   (written on last chunk)
    gates_ref:   (Tc*Bb, 4E)   scratch: hoisted x-projection + bias
    hseq_ref:    (Tc*Bb, E)    scratch: per-step hidden states for batched FC
    h_carry_ref: (Bb, E)       scratch: hidden state carried across chunks
    c_carry_ref: (Bb, E)       scratch: cell   state carried across chunks
    """
    Tc, Bb, D = x_ref.shape
    E = h0_ref.shape[1]
    t_chunk = pl.program_id(1)
    n_chunks = pl.num_programs(1)

    # First chunk of each batch block: load the initial recurrent state.
    @pl.when(t_chunk == 0)
    def _():
        h_carry_ref[...] = h0_ref[...]
        c_carry_ref[...] = c0_ref[...]

    # (1) Hoisted input projection + bias for the whole chunk — one MXU op.
    #     Reshape (Tc, Bb, D) -> (Tc*Bb, D) is tile-aligned (Bb % 8 == 0).
    x2d = x_ref[...].reshape(Tc * Bb, D)
    gates_ref[...] = (
        jnp.dot(x2d, wih_t_ref[...], preferred_element_type=jnp.float32)
        + b_ref[...]
    )

    whh_t = whh_t_ref[...]

    def step(t, carry):
        h, c = carry
        row = pl.multiple_of(t * Bb, 8)
        # Only h @ W_hh^T remains on the serial critical path.
        g = gates_ref[pl.ds(row, Bb), :] + jnp.dot(
            h, whh_t, preferred_element_type=jnp.float32)        # (Bb, 4E)
        # gate order (i, f, o, g): one sigmoid over the contiguous [0:3E] slab.
        sig = jax.nn.sigmoid(g[:, :3 * E])
        i_g = sig[:, 0:E]
        f_g = sig[:, E:2 * E]
        o_g = sig[:, 2 * E:3 * E]
        g_g = jnp.tanh(g[:, 3 * E:])
        c_new = f_g * c + i_g * g_g
        h_new = o_g * jnp.tanh(c_new)
        hseq_ref[pl.ds(row, Bb), :] = h_new
        return (h_new, c_new)

    # Bounded unroll: full only for small chunks (avoids vreg spills at big Tc).
    unroll = Tc if Tc <= 8 else 4
    h_fin, c_fin = lax.fori_loop(0, Tc, step,
                                 (h_carry_ref[...], c_carry_ref[...]),
                                 unroll=unroll)
    h_carry_ref[...] = h_fin
    c_carry_ref[...] = c_fin

    # (2) Hoisted FC head — one batched MXU op + one contiguous store.
    y2d = (jnp.dot(hseq_ref[...], wfc_t_ref[...],
                   preferred_element_type=jnp.float32) + bfc_ref[...])
    y_ref[...] = y2d.reshape(Tc, Bb, D)

    @pl.when(t_chunk == n_chunks - 1)
    def _():
        h_out_ref[...] = h_fin
        c_out_ref[...] = c_fin


def _pick_time_chunk(T, target):
    """Largest divisor of T that is <= target."""
    for c in range(min(T, target), 0, -1):
        if T % c == 0:
            return c
    return T


def decoder_forward(x, h0, c0, params, *, time_chunk=8):
    """x:(B,T,D)  h0,c0:(1,B,E)  ->  (y:(B,T,D), h:(1,B,E), c:(1,B,E))"""
    B, T, D = x.shape
    E = params["w_hh"].shape[1]

    # Batch blocking: one "parallel" grid axis.  On v7x set >= 2 blocks for big
    # batches so both TensorCores run independent batch slices; each block must
    # be a multiple of 8 rows (f32 sublane tile).
    nb = 2 if B >= 16 else 1
    Bp = ((B + 8 * nb - 1) // (8 * nb)) * (8 * nb)
    Bb = Bp // nb

    # Time chunking ("arbitrary" axis): chunk-sized scratch + software pipeline.
    Tc = _pick_time_chunk(T, time_chunk)
    nt = T // Tc

    # time-major, batch-padded input (kept 3-D so BlockSpec can tile both axes)
    # TODO(synk): fold this transpose/pad into the BlockSpec index_map to save
    #             an HBM pass over x (matters most on v5e at production sizes).
    x_tm = jnp.transpose(x, (1, 0, 2)).astype(jnp.float32)       # (T, B, D)
    if Bp != B:
        x_tm = jnp.pad(x_tm, ((0, 0), (0, Bp - B), (0, 0)))

    h0_2d = h0[0].astype(jnp.float32)                            # (B, E)
    c0_2d = c0[0].astype(jnp.float32)
    if Bp != B:
        h0_2d = jnp.pad(h0_2d, ((0, Bp - B), (0, 0)))
        c0_2d = jnp.pad(c0_2d, ((0, Bp - B), (0, 0)))

    # Reorder gate rows from PyTorch (i, f, g, o) -> (i, f, o, g).
    def reorder(w):
        return jnp.concatenate([w[:2 * E], w[3 * E:4 * E], w[2 * E:3 * E]],
                               axis=0)

    wih_t = jnp.transpose(reorder(params["w_ih"].astype(jnp.float32)))   # (D, 4E)
    whh_t = jnp.transpose(reorder(params["w_hh"].astype(jnp.float32)))   # (E, 4E)
    b = reorder((params["b_ih"] + params["b_hh"]).astype(jnp.float32)
                ).reshape(1, 4 * E)
    wfc_t = jnp.transpose(params["w_fc"].astype(jnp.float32))            # (E, D)
    bfc = params["b_fc"].astype(jnp.float32).reshape(1, D)

    # VMEM budget: double-buffered x/y/h/c blocks + resident weights + scratch.
    f32 = 4
    block_bytes = (
        2 * Tc * Bb * D * f32            # x block (double buffered)
        + 2 * Tc * Bb * D * f32          # y block
        + 4 * 2 * Bb * E * f32           # h0, c0, h_out, c_out blocks
        + 2 * (D * 4 * E + E * 4 * E + 4 * E + E * D + D) * f32  # weights
        + (Tc * Bb * 4 * E + Tc * Bb * E + 2 * Bb * E) * f32     # scratch
    )
    vmem_limit = int(min(48 * 2**20, max(4 * 2**20, 2 * block_bytes)))

    cost = pl.CostEstimate(
        flops=2 * T * Bp * (D * 4 * E + E * 4 * E + E * D),
        transcendentals=5 * T * Bp * E,
        bytes_accessed=f32 * (2 * T * Bp * D + 4 * Bp * E
                              + D * 4 * E + E * 4 * E + 4 * E + E * D + D),
    )

    grid_spec = pltpu.PrefetchScalarGridSpec(
        num_scalar_prefetch=0,
        grid=(nb, nt),                                   # batch outer, time inner
        in_specs=[
            pl.BlockSpec((Tc, Bb, D), lambda bi, ti: (ti, bi, 0)),   # x
            pl.BlockSpec((Bb, E),     lambda bi, ti: (bi, 0)),       # h0
            pl.BlockSpec((Bb, E),     lambda bi, ti: (bi, 0)),       # c0
            pl.BlockSpec((D, 4 * E),  lambda bi, ti: (0, 0)),        # W_ih^T
            pl.BlockSpec((E, 4 * E),  lambda bi, ti: (0, 0)),        # W_hh^T
            pl.BlockSpec((1, 4 * E),  lambda bi, ti: (0, 0)),        # bias
            pl.BlockSpec((E, D),      lambda bi, ti: (0, 0)),        # W_fc^T
            pl.BlockSpec((1, D),      lambda bi, ti: (0, 0)),        # b_fc
        ],
        out_specs=(
            pl.BlockSpec((Tc, Bb, D), lambda bi, ti: (ti, bi, 0)),   # y
            pl.BlockSpec((Bb, E),     lambda bi, ti: (bi, 0)),       # h_out
            pl.BlockSpec((Bb, E),     lambda bi, ti: (bi, 0)),       # c_out
        ),
        scratch_shapes=[
            pltpu.VMEM((Tc * Bb, 4 * E), jnp.float32),   # hoisted x-gates
            pltpu.VMEM((Tc * Bb, E), jnp.float32),       # hidden-state sequence
            pltpu.VMEM((Bb, E), jnp.float32),            # h carry across chunks
            pltpu.VMEM((Bb, E), jnp.float32),            # c carry across chunks
        ],
    )

    y_tm, h_out, c_out = pl.pallas_call(
        _decoder_kernel,
        out_shape=(
            jax.ShapeDtypeStruct((T, Bp, D), jnp.float32),
            jax.ShapeDtypeStruct((Bp, E), jnp.float32),
            jax.ShapeDtypeStruct((Bp, E), jnp.float32),
        ),
        grid_spec=grid_spec,
        compiler_params=pltpu.CompilerParams(
            dimension_semantics=("parallel", "arbitrary"),
            vmem_limit_bytes=vmem_limit),
        cost_estimate=cost,
    )(x_tm, h0_2d, c0_2d, wih_t, whh_t, b, wfc_t, bfc)

    y = jnp.transpose(y_tm[:, :B, :], (1, 0, 2))                         # (B, T, D)
    return y, h_out[None, :B, :], c_out[None, :B, :]


def _reference_forward(x, h0, c0, params):
    """Pure-JAX reference mirroring torch.nn.LSTM + Linear (PyTorch i,f,g,o order)."""
    E = params["w_hh"].shape[1]
    wih_t = params["w_ih"].T
    whh_t = params["w_hh"].T
    b = params["b_ih"] + params["b_hh"]
    h, c = h0[0], c0[0]
    ys = []
    for t in range(x.shape[1]):
        gates = x[:, t, :] @ wih_t + h @ whh_t + b
        i_g = jax.nn.sigmoid(gates[:, 0 * E:1 * E])
        f_g = jax.nn.sigmoid(gates[:, 1 * E:2 * E])
        g_g = jnp.tanh(gates[:, 2 * E:3 * E])
        o_g = jax.nn.sigmoid(gates[:, 3 * E:4 * E])
        c = f_g * c + i_g * g_g
        h = o_g * jnp.tanh(c)
        ys.append(h @ params["w_fc"].T + params["b_fc"])
    y = jnp.stack(ys, axis=1)
    return y, h[None], c[None]


def init_params(key, embedding_dim, output_dim):
    E, D = embedding_dim, output_dim
    ks = jax.random.split(key, 6)
    s = 1.0 / jnp.sqrt(E)
    return {
        "w_ih": jax.random.uniform(ks[0], (4 * E, D), jnp.float32, -s, s),
        "w_hh": jax.random.uniform(ks[1], (4 * E, E), jnp.float32, -s, s),
        "b_ih": jax.random.uniform(ks[2], (4 * E,), jnp.float32, -s, s),
        "b_hh": jax.random.uniform(ks[3], (4 * E,), jnp.float32, -s, s),
        "w_fc": jax.random.uniform(ks[4], (D, E), jnp.float32, -s, s),
        "b_fc": jax.random.uniform(ks[5], (D,), jnp.float32, -s, s),
    }


if __name__ == "__main__":
    B, T = 2, 8               # batch, sequence length
    embedding_dim = 32        # LSTM hidden size E
    output_dim = 16           # LSTM input size / fc output size D

    key = jax.random.PRNGKey(0)
    k_x, k_h, k_c, k_p = jax.random.split(key, 4)
    x = jax.random.normal(k_x, (B, T, output_dim), jnp.float32)
    h0 = jax.random.normal(k_h, (1, B, embedding_dim), jnp.float32)
    c0 = jax.random.normal(k_c, (1, B, embedding_dim), jnp.float32)
    params = init_params(k_p, embedding_dim, output_dim)

    # time_chunk=4 -> two time chunks: exercises the cross-chunk h/c carry.
    y, h, c = decoder_forward(x, h0, c0, params, time_chunk=4)
    jax.block_until_ready((y, h, c))

    y_ref, h_ref, c_ref = _reference_forward(x, h0, c0, params)
    assert y.shape == (B, T, output_dim)
    assert h.shape == (1, B, embedding_dim) and c.shape == (1, B, embedding_dim)
    assert jnp.allclose(y, y_ref, atol=1e-5, rtol=1e-5)
    assert jnp.allclose(h, h_ref, atol=1e-5, rtol=1e-5)
    assert jnp.allclose(c, c_ref, atol=1e-5, rtol=1e-5)

    print("KERNEL_OK")
</pallas_src>

<mosaic_0001>
module attributes {stable_mosaic.version = 11 : i64} {
  func.func @_decoder_kernel(%arg0: i32, %arg1: i32, %arg2: memref<4x8x16xf32, #tpu.memory_space<vmem>>, %arg3: memref<8x32xf32, #tpu.memory_space<vmem>>, %arg4: memref<8x32xf32, #tpu.memory_space<vmem>>, %arg5: memref<16x128xf32, #tpu.memory_space<vmem>>, %arg6: memref<32x128xf32, #tpu.memory_space<vmem>>, %arg7: memref<1x128xf32, #tpu.memory_space<vmem>>, %arg8: memref<32x16xf32, #tpu.memory_space<vmem>>, %arg9: memref<1x16xf32, #tpu.memory_space<vmem>>, %arg10: memref<4x8x16xf32, #tpu.memory_space<vmem>>, %arg11: memref<8x32xf32, #tpu.memory_space<vmem>>, %arg12: memref<8x32xf32, #tpu.memory_space<vmem>>, %arg13: memref<32x128xf32, #tpu.memory_space<vmem>>, %arg14: memref<32x32xf32, #tpu.memory_space<vmem>>, %arg15: memref<8x32xf32, #tpu.memory_space<vmem>>, %arg16: memref<8x32xf32, #tpu.memory_space<vmem>>) attributes {dimension_semantics = [#tpu.dimension_semantics<parallel>, #tpu.dimension_semantics<arbitrary>], iteration_bounds = array<i64: 1, 2>, scalar_prefetch = 0 : i64, scratch_operands = 4 : i64, tpu.core_type = #tpu.core_type<tc>, window_params = [{transform_indices = @transform_0, window_bounds = array<i64: 4, 8, 16>}, {transform_indices = @transform_1, window_bounds = array<i64: 8, 32>}, {transform_indices = @transform_2, window_bounds = array<i64: 8, 32>}, {pipeline_mode = #tpu.pipeline_mode<synchronous>, transform_indices = @transform_3, window_bounds = array<i64: 16, 128>}, {pipeline_mode = #tpu.pipeline_mode<synchronous>, transform_indices = @transform_4, window_bounds = array<i64: 32, 128>}, {pipeline_mode = #tpu.pipeline_mode<synchronous>, transform_indices = @transform_5, window_bounds = array<i64: 1, 128>}, {pipeline_mode = #tpu.pipeline_mode<synchronous>, transform_indices = @transform_6, window_bounds = array<i64: 32, 16>}, {pipeline_mode = #tpu.pipeline_mode<synchronous>, transform_indices = @transform_7, window_bounds = array<i64: 1, 16>}, {transform_indices = @transform_8, window_bounds = array<i64: 4, 8, 16>}, {transform_indices = @transform_9, window_bounds = array<i64: 8, 32>}, {transform_indices = @transform_10, window_bounds = array<i64: 8, 32>}]} {
    %c0_i32 = arith.constant 0 : i32
    %0 = arith.cmpi eq, %arg1, %c0_i32 : i32
    %1 = arith.extui %0 : i1 to i32
    %c0_i32_0 = arith.constant 0 : i32
    %2 = arith.cmpi ne, %1, %c0_i32_0 : i32
    scf.if %2 {
      %c0_51 = arith.constant 0 : index
      %c0_52 = arith.constant 0 : index
      %123 = vector.load %arg3[%c0_51, %c0_52] : memref<8x32xf32, #tpu.memory_space<vmem>>, vector<8x32xf32>
      %c0_53 = arith.constant 0 : index
      %c0_54 = arith.constant 0 : index
      %124 = vector.load %arg15[%c0_53, %c0_54] : memref<8x32xf32, #tpu.memory_space<vmem>>, vector<8x32xf32>
      tpu.vector_store %arg15[%c0_53, %c0_54], %123 {strides = array<i32>} : memref<8x32xf32, #tpu.memory_space<vmem>>, vector<8x32xf32>,
      %c0_55 = arith.constant 0 : index
      %c0_56 = arith.constant 0 : index
      %125 = vector.load %arg4[%c0_55, %c0_56] : memref<8x32xf32, #tpu.memory_space<vmem>>, vector<8x32xf32>
      %c0_57 = arith.constant 0 : index
      %c0_58 = arith.constant 0 : index
      %126 = vector.load %arg16[%c0_57, %c0_58] : memref<8x32xf32, #tpu.memory_space<vmem>>, vector<8x32xf32>
      tpu.vector_store %arg16[%c0_57, %c0_58], %125 {strides = array<i32>} : memref<8x32xf32, #tpu.memory_space<vmem>>, vector<8x32xf32>,
    } else {
    }
    %c0 = arith.constant 0 : index
    %c0_1 = arith.constant 0 : index
    %c0_2 = arith.constant 0 : index
    %3 = vector.load %arg2[%c0, %c0_1, %c0_2] : memref<4x8x16xf32, #tpu.memory_space<vmem>>, vector<4x8x16xf32>
    %4 = vector.shape_cast %3 : vector<4x8x16xf32> to vector<32x16xf32>
    %c0_3 = arith.constant 0 : index
    %c0_4 = arith.constant 0 : index
    %5 = vector.load %arg5[%c0_3, %c0_4] : memref<16x128xf32, #tpu.memory_space<vmem>>, vector<16x128xf32>
    %cst = arith.constant dense<0.000000e+00> : vector<32x128xf32>
    %6 = tpu.matmul %4, %5, %cst {dimension_numbers = #tpu.dot_dimension_numbers<[1], [0], [0], [1], [0, 0, 1, 1], [], []>} : vector<32x16xf32>, vector<16x128xf32>, vector<32x128xf32> -> vector<32x128xf32>
    %c0_5 = arith.constant 0 : index
    %c0_6 = arith.constant 0 : index
    %7 = vector.load %arg7[%c0_5, %c0_6] : memref<1x128xf32, #tpu.memory_space<vmem>>, vector<1x128xf32>
    %8 = vector.broadcast %7 : vector<1x128xf32> to vector<32x128xf32>
    %9 = arith.addf %6, %8 : vector<32x128xf32>
    %c0_7 = arith.constant 0 : index
    %c0_8 = arith.constant 0 : index
    %10 = vector.load %arg13[%c0_7, %c0_8] : memref<32x128xf32, #tpu.memory_space<vmem>>, vector<32x128xf32>
    tpu.vector_store %arg13[%c0_7, %c0_8], %9 {strides = array<i32>} : memref<32x128xf32, #tpu.memory_space<vmem>>, vector<32x128xf32>,
    %c0_9 = arith.constant 0 : index
    %c0_10 = arith.constant 0 : index
    %11 = vector.load %arg6[%c0_9, %c0_10] : memref<32x128xf32, #tpu.memory_space<vmem>>, vector<32x128xf32>
    %c0_11 = arith.constant 0 : index
    %c0_12 = arith.constant 0 : index
    %12 = vector.load %arg15[%c0_11, %c0_12] : memref<8x32xf32, #tpu.memory_space<vmem>>, vector<8x32xf32>
    %c0_13 = arith.constant 0 : index
    %c0_14 = arith.constant 0 : index
    %13 = vector.load %arg16[%c0_13, %c0_14] : memref<8x32xf32, #tpu.memory_space<vmem>>, vector<8x32xf32>
    %c0_i32_15 = arith.constant 0 : i32
    %c8_i32 = arith.constant 8 : i32
    %14 = arith.muli %c0_i32_15, %c8_i32 : i32
    %15 = tpu.assume_multiple %14, 8 : i32
    %16 = arith.index_cast %15 : i32 to index
    %c0_16 = arith.constant 0 : index
    %17 = vector.load %arg13[%16, %c0_16] : memref<32x128xf32, #tpu.memory_space<vmem>>, vector<8x128xf32>
    %cst_17 = arith.constant dense<0.000000e+00> : vector<8x128xf32>
    %18 = tpu.matmul %12, %11, %cst_17 {dimension_numbers = #tpu.dot_dimension_numbers<[1], [0], [0], [1], [0, 0, 1, 1], [], []>} : vector<8x32xf32>, vector<32x128xf32>, vector<8x128xf32> -> vector<8x128xf32>
    %19 = arith.addf %17, %18 : vector<8x128xf32>
    %20 = vector.extract_strided_slice %19 {offsets = [0, 0], sizes = [8, 96], strides = [1, 1]} : vector<8x128xf32> to vector<8x96xf32>
    %21 = arith.negf %20 : vector<8x96xf32>
    %22 = math.exp %21 : vector<8x96xf32>
    %cst_18 = arith.constant 1.000000e+00 : f32
    %23 = vector.broadcast %cst_18 : f32 to vector<8x96xf32>
    %24 = arith.addf %23, %22 : vector<8x96xf32>
    %25 = arith.divf %23, %24 : vector<8x96xf32>
    %26 = vector.extract_strided_slice %25 {offsets = [0, 0], sizes = [8, 32], strides = [1, 1]} : vector<8x96xf32> to vector<8x32xf32>
    %27 = vector.extract_strided_slice %25 {offsets = [0, 32], sizes = [8, 32], strides = [1, 1]} : vector<8x96xf32> to vector<8x32xf32>
    %28 = vector.extract_strided_slice %25 {offsets = [0, 64], sizes = [8, 32], strides = [1, 1]} : vector<8x96xf32> to vector<8x32xf32>
    %29 = vector.extract_strided_slice %19 {offsets = [0, 96], sizes = [8, 32], strides = [1, 1]} : vector<8x128xf32> to vector<8x32xf32>
    %30 = math.tanh %29 : vector<8x32xf32>
    %31 = arith.mulf %27, %13 : vector<8x32xf32>
    %32 = arith.mulf %26, %30 : vector<8x32xf32>
    %33 = arith.addf %31, %32 : vector<8x32xf32>
    %34 = math.tanh %33 : vector<8x32xf32>
    %35 = arith.mulf %28, %34 : vector<8x32xf32>
    %36 = arith.index_cast %15 : i32 to index
    %c0_19 = arith.constant 0 : index
    %37 = vector.load %arg14[%36, %c0_19] : memref<32x32xf32, #tpu.memory_space<vmem>>, vector<8x32xf32>
    tpu.vector_store %arg14[%36, %c0_19], %35 {strides = array<i32>} : memref<32x32xf32, #tpu.memory_space<vmem>>, vector<8x32xf32>,
    %c1_i32 = arith.constant 1 : i32
    %c8_i32_20 = arith.constant 8 : i32
    %38 = arith.muli %c1_i32, %c8_i32_20 : i32
    %39 = tpu.assume_multiple %38, 8 : i32
    %40 = arith.index_cast %39 : i32 to index
    %c0_21 = arith.constant 0 : index
    %41 = vector.load %arg13[%40, %c0_21] : memref<32x128xf32, #tpu.memory_space<vmem>>, vector<8x128xf32>
    %cst_22 = arith.constant dense<0.000000e+00> : vector<8x128xf32>
    %42 = tpu.matmul %35, %11, %cst_22 {dimension_numbers = #tpu.dot_dimension_numbers<[1], [0], [0], [1], [0, 0, 1, 1], [], []>} : vector<8x32xf32>, vector<32x128xf32>, vector<8x128xf32> -> vector<8x128xf32>
    %43 = arith.addf %41, %42 : vector<8x128xf32>
    %44 = vector.extract_strided_slice %43 {offsets = [0, 0], sizes = [8, 96], strides = [1, 1]} : vector<8x128xf32> to vector<8x96xf32>
    %45 = arith.negf %44 : vector<8x96xf32>
    %46 = math.exp %45 : vector<8x96xf32>
    %cst_23 = arith.constant 1.000000e+00 : f32
    %47 = vector.broadcast %cst_23 : f32 to vector<8x96xf32>
    %48 = arith.addf %47, %46 : vector<8x96xf32>
    %49 = arith.divf %47, %48 : vector<8x96xf32>
    %50 = vector.extract_strided_slice %49 {offsets = [0, 0], sizes = [8, 32], strides = [1, 1]} : vector<8x96xf32> to vector<8x32xf32>
    %51 = vector.extract_strided_slice %49 {offsets = [0, 32], sizes = [8, 32], strides = [1, 1]} : vector<8x96xf32> to vector<8x32xf32>
    %52 = vector.extract_strided_slice %49 {offsets = [0, 64], sizes = [8, 32], strides = [1, 1]} : vector<8x96xf32> to vector<8x32xf32>
    %53 = vector.extract_strided_slice %43 {offsets = [0, 96], sizes = [8, 32], strides = [1, 1]} : vector<8x128xf32> to vector<8x32xf32>
    %54 = math.tanh %53 : vector<8x32xf32>
    %55 = arith.mulf %51, %33 : vector<8x32xf32>
    %56 = arith.mulf %50, %54 : vector<8x32xf32>
    %57 = arith.addf %55, %56 : vector<8x32xf32>
    %58 = math.tanh %57 : vector<8x32xf32>
    %59 = arith.mulf %52, %58 : vector<8x32xf32>
    %60 = arith.index_cast %39 : i32 to index
    %c0_24 = arith.constant 0 : index
    %61 = vector.load %arg14[%60, %c0_24] : memref<32x32xf32, #tpu.memory_space<vmem>>, vector<8x32xf32>
    tpu.vector_store %arg14[%60, %c0_24], %59 {strides = array<i32>} : memref<32x32xf32, #tpu.memory_space<vmem>>, vector<8x32xf32>,
    %c2_i32 = arith.constant 2 : i32
    %c8_i32_25 = arith.constant 8 : i32
    %62 = arith.muli %c2_i32, %c8_i32_25 : i32
    %63 = tpu.assume_multiple %62, 8 : i32
    %64 = arith.index_cast %63 : i32 to index
    %c0_26 = arith.constant 0 : index
    %65 = vector.load %arg13[%64, %c0_26] : memref<32x128xf32, #tpu.memory_space<vmem>>, vector<8x128xf32>
    %cst_27 = arith.constant dense<0.000000e+00> : vector<8x128xf32>
    %66 = tpu.matmul %59, %11, %cst_27 {dimension_numbers = #tpu.dot_dimension_numbers<[1], [0], [0], [1], [0, 0, 1, 1], [], []>} : vector<8x32xf32>, vector<32x128xf32>, vector<8x128xf32> -> vector<8x128xf32>
    %67 = arith.addf %65, %66 : vector<8x128xf32>
    %68 = vector.extract_strided_slice %67 {offsets = [0, 0], sizes = [8, 96], strides = [1, 1]} : vector<8x128xf32> to vector<8x96xf32>
    %69 = arith.negf %68 : vector<8x96xf32>
    %70 = math.exp %69 : vector<8x96xf32>
    %cst_28 = arith.constant 1.000000e+00 : f32
    %71 = vector.broadcast %cst_28 : f32 to vector<8x96xf32>
    %72 = arith.addf %71, %70 : vector<8x96xf32>
    %73 = arith.divf %71, %72 : vector<8x96xf32>
    %74 = vector.extract_strided_slice %73 {offsets = [0, 0], sizes = [8, 32], strides = [1, 1]} : vector<8x96xf32> to vector<8x32xf32>
    %75 = vector.extract_strided_slice %73 {offsets = [0, 32], sizes = [8, 32], strides = [1, 1]} : vector<8x96xf32> to vector<8x32xf32>
    %76 = vector.extract_strided_slice %73 {offsets = [0, 64], sizes = [8, 32], strides = [1, 1]} : vector<8x96xf32> to vector<8x32xf32>
    %77 = vector.extract_strided_slice %67 {offsets = [0, 96], sizes = [8, 32], strides = [1, 1]} : vector<8x128xf32> to vector<8x32xf32>
    %78 = math.tanh %77 : vector<8x32xf32>
    %79 = arith.mulf %75, %57 : vector<8x32xf32>
    %80 = arith.mulf %74, %78 : vector<8x32xf32>
    %81 = arith.addf %79, %80 : vector<8x32xf32>
    %82 = math.tanh %81 : vector<8x32xf32>
    %83 = arith.mulf %76, %82 : vector<8x32xf32>
    %84 = arith.index_cast %63 : i32 to index
    %c0_29 = arith.constant 0 : index
    %85 = vector.load %arg14[%84, %c0_29] : memref<32x32xf32, #tpu.memory_space<vmem>>, vector<8x32xf32>
    tpu.vector_store %arg14[%84, %c0_29], %83 {strides = array<i32>} : memref<32x32xf32, #tpu.memory_space<vmem>>, vector<8x32xf32>,
    %c3_i32 = arith.constant 3 : i32
    %c8_i32_30 = arith.constant 8 : i32
    %86 = arith.muli %c3_i32, %c8_i32_30 : i32
    %87 = tpu.assume_multiple %86, 8 : i32
    %88 = arith.index_cast %87 : i32 to index
    %c0_31 = arith.constant 0 : index
    %89 = vector.load %arg13[%88, %c0_31] : memref<32x128xf32, #tpu.memory_space<vmem>>, vector<8x128xf32>
    %cst_32 = arith.constant dense<0.000000e+00> : vector<8x128xf32>
    %90 = tpu.matmul %83, %11, %cst_32 {dimension_numbers = #tpu.dot_dimension_numbers<[1], [0], [0], [1], [0, 0, 1, 1], [], []>} : vector<8x32xf32>, vector<32x128xf32>, vector<8x128xf32> -> vector<8x128xf32>
    %91 = arith.addf %89, %90 : vector<8x128xf32>
    %92 = vector.extract_strided_slice %91 {offsets = [0, 0], sizes = [8, 96], strides = [1, 1]} : vector<8x128xf32> to vector<8x96xf32>
    %93 = arith.negf %92 : vector<8x96xf32>
    %94 = math.exp %93 : vector<8x96xf32>
    %cst_33 = arith.constant 1.000000e+00 : f32
    %95 = vector.broadcast %cst_33 : f32 to vector<8x96xf32>
    %96 = arith.addf %95, %94 : vector<8x96xf32>
    %97 = arith.divf %95, %96 : vector<8x96xf32>
    %98 = vector.extract_strided_slice %97 {offsets = [0, 0], sizes = [8, 32], strides = [1, 1]} : vector<8x96xf32> to vector<8x32xf32>
    %99 = vector.extract_strided_slice %97 {offsets = [0, 32], sizes = [8, 32], strides = [1, 1]} : vector<8x96xf32> to vector<8x32xf32>
    %100 = vector.extract_strided_slice %97 {offsets = [0, 64], sizes = [8, 32], strides = [1, 1]} : vector<8x96xf32> to vector<8x32xf32>
    %101 = vector.extract_strided_slice %91 {offsets = [0, 96], sizes = [8, 32], strides = [1, 1]} : vector<8x128xf32> to vector<8x32xf32>
    %102 = math.tanh %101 : vector<8x32xf32>
    %103 = arith.mulf %99, %81 : vector<8x32xf32>
    %104 = arith.mulf %98, %102 : vector<8x32xf32>
    %105 = arith.addf %103, %104 : vector<8x32xf32>
    %106 = math.tanh %105 : vector<8x32xf32>
    %107 = arith.mulf %100, %106 : vector<8x32xf32>
    %108 = arith.index_cast %87 : i32 to index
    %c0_34 = arith.constant 0 : index
    %109 = vector.load %arg14[%108, %c0_34] : memref<32x32xf32, #tpu.memory_space<vmem>>, vector<8x32xf32>
    tpu.vector_store %arg14[%108, %c0_34], %107 {strides = array<i32>} : memref<32x32xf32, #tpu.memory_space<vmem>>, vector<8x32xf32>,
    %c4_i32 = arith.constant 4 : i32
    %c0_35 = arith.constant 0 : index
    %c0_36 = arith.constant 0 : index
    %110 = vector.load %arg15[%c0_35, %c0_36] : memref<8x32xf32, #tpu.memory_space<vmem>>, vector<8x32xf32>
    tpu.vector_store %arg15[%c0_35, %c0_36], %107 {strides = array<i32>} : memref<8x32xf32, #tpu.memory_space<vmem>>, vector<8x32xf32>,
    %c0_37 = arith.constant 0 : index
    %c0_38 = arith.constant 0 : index
    %111 = vector.load %arg16[%c0_37, %c0_38] : memref<8x32xf32, #tpu.memory_space<vmem>>, vector<8x32xf32>
    tpu.vector_store %arg16[%c0_37, %c0_38], %105 {strides = array<i32>} : memref<8x32xf32, #tpu.memory_space<vmem>>, vector<8x32xf32>,
    %c0_39 = arith.constant 0 : index
    %c0_40 = arith.constant 0 : index
    %112 = vector.load %arg14[%c0_39, %c0_40] : memref<32x32xf32, #tpu.memory_space<vmem>>, vector<32x32xf32>
    %c0_41 = arith.constant 0 : index
    %c0_42 = arith.constant 0 : index
    %113 = vector.load %arg8[%c0_41, %c0_42] : memref<32x16xf32, #tpu.memory_space<vmem>>, vector<32x16xf32>
    %cst_43 = arith.constant dense<0.000000e+00> : vector<32x16xf32>
    %114 = tpu.matmul %112, %113, %cst_43 {dimension_numbers = #tpu.dot_dimension_numbers<[1], [0], [0], [1], [0, 0, 1, 1], [], []>} : vector<32x32xf32>, vector<32x16xf32>, vector<32x16xf32> -> vector<32x16xf32>
    %c0_44 = arith.constant 0 : index
    %c0_45 = arith.constant 0 : index
    %115 = vector.load %arg9[%c0_44, %c0_45] : memref<1x16xf32, #tpu.memory_space<vmem>>, vector<1x16xf32>
    %116 = vector.broadcast %115 : vector<1x16xf32> to vector<32x16xf32>
    %117 = arith.addf %114, %116 : vector<32x16xf32>
    %118 = vector.shape_cast %117 : vector<32x16xf32> to vector<4x8x16xf32>
    %c0_46 = arith.constant 0 : index
    %c0_47 = arith.constant 0 : index
    %c0_48 = arith.constant 0 : index
    %119 = vector.load %arg10[%c0_46, %c0_47, %c0_48] : memref<4x8x16xf32, #tpu.memory_space<vmem>>, vector<4x8x16xf32>
    tpu.vector_store %arg10[%c0_46, %c0_47, %c0_48], %118 {strides = array<i32>} : memref<4x8x16xf32, #tpu.memory_space<vmem>>, vector<4x8x16xf32>,
    %c1_i32_49 = arith.constant 1 : i32
    %120 = arith.cmpi eq, %arg1, %c1_i32_49 : i32
    %121 = arith.extui %120 : i1 to i32
    %c0_i32_50 = arith.constant 0 : i32
    %122 = arith.cmpi ne, %121, %c0_i32_50 : i32
    scf.if %122 {
      %c0_51 = arith.constant 0 : index
      %c0_52 = arith.constant 0 : index
      %123 = vector.load %arg11[%c0_51, %c0_52] : memref<8x32xf32, #tpu.memory_space<vmem>>, vector<8x32xf32>
      tpu.vector_store %arg11[%c0_51, %c0_52], %107 {strides = array<i32>} : memref<8x32xf32, #tpu.memory_space<vmem>>, vector<8x32xf32>,
      %c0_53 = arith.constant 0 : index
      %c0_54 = arith.constant 0 : index
      %124 = vector.load %arg12[%c0_53, %c0_54] : memref<8x32xf32, #tpu.memory_space<vmem>>, vector<8x32xf32>
      tpu.vector_store %arg12[%c0_53, %c0_54], %105 {strides = array<i32>} : memref<8x32xf32, #tpu.memory_space<vmem>>, vector<8x32xf32>,
    } else {
    }
    return
  }
  func.func @transform_0(%arg0: i32, %arg1: i32) -> (i32, i32, i32) {
    %c0_i32 = arith.constant 0 : i32
    %c0_i32_0 = arith.constant 0 : i32
    return %arg1, %arg0, %c0_i32 : i32, i32, i32
  }
  func.func @transform_1(%arg0: i32, %arg1: i32) -> (i32, i32) {
    %c0_i32 = arith.constant 0 : i32
    %c0_i32_0 = arith.constant 0 : i32
    return %arg0, %c0_i32 : i32, i32
  }
  func.func @transform_2(%arg0: i32, %arg1: i32) -> (i32, i32) {
    %c0_i32 = arith.constant 0 : i32
    %c0_i32_0 = arith.constant 0 : i32
    return %arg0, %c0_i32 : i32, i32
  }
  func.func @transform_3(%arg0: i32, %arg1: i32) -> (i32, i32) {
    %c0_i32 = arith.constant 0 : i32
    %c0_i32_0 = arith.constant 0 : i32
    %c0_i32_1 = arith.constant 0 : i32
    return %c0_i32, %c0_i32_0 : i32, i32
  }
  func.func @transform_4(%arg0: i32, %arg1: i32) -> (i32, i32) {
    %c0_i32 = arith.constant 0 : i32
    %c0_i32_0 = arith.constant 0 : i32
    %c0_i32_1 = arith.constant 0 : i32
    return %c0_i32, %c0_i32_0 : i32, i32
  }
  func.func @transform_5(%arg0: i32, %arg1: i32) -> (i32, i32) {
    %c0_i32 = arith.constant 0 : i32
    %c0_i32_0 = arith.constant 0 : i32
    %c0_i32_1 = arith.constant 0 : i32
    return %c0_i32, %c0_i32_0 : i32, i32
  }
  func.func @transform_6(%arg0: i32, %arg1: i32) -> (i32, i32) {
    %c0_i32 = arith.constant 0 : i32
    %c0_i32_0 = arith.constant 0 : i32
    %c0_i32_1 = arith.constant 0 : i32
    return %c0_i32, %c0_i32_0 : i32, i32
  }
  func.func @transform_7(%arg0: i32, %arg1: i32) -> (i32, i32) {
    %c0_i32 = arith.constant 0 : i32
    %c0_i32_0 = arith.constant 0 : i32
    %c0_i32_1 = arith.constant 0 : i32
    return %c0_i32, %c0_i32_0 : i32, i32
  }
  func.func @transform_8(%arg0: i32, %arg1: i32) -> (i32, i32, i32) {
    %c0_i32 = arith.constant 0 : i32
    %c0_i32_0 = arith.constant 0 : i32
    return %arg1, %arg0, %c0_i32 : i32, i32, i32
  }
  func.func @transform_9(%arg0: i32, %arg1: i32) -> (i32, i32) {
    %c0_i32 = arith.constant 0 : i32
    %c0_i32_0 = arith.constant 0 : i32
    return %arg0, %c0_i32 : i32, i32
  }
  func.func @transform_10(%arg0: i32, %arg1: i32) -> (i32, i32) {
    %c0_i32 = arith.constant 0 : i32
    %c0_i32_0 = arith.constant 0 : i32
    return %arg0, %c0_i32 : i32, i32
  }
}

</mosaic_0001>

<bundles_post_ra>
// kernel: tpu_custom_call.1
= control target key start
LH: loop header
LB: loop body
LE: loop exit
PB: predicated region body
PF: predicated region fallthrough
CT: control target
= control target key end

     0   :  { %s2344_s0 = inlined_call_operand.hbm [shape: f32[8,8,16], index: 0, kind: input, shape index: {}]   ;;  %s2345_s1 = inlined_call_operand.hbm [shape: f32[8,32], index: 1, kind: input, shape index: {}]   ;;  %s2346_s2 = inlined_call_operand.hbm [shape: f32[8,32], index: 2, kind: input, shape index: {}]   ;;  %s2347_s3 = inlined_call_operand.vmem [shape: f32[16,128], index: 3, kind: input, shape index: {}]   ;;  %s2348_s4 = inlined_call_operand.vmem [shape: f32[32,128], index: 4, kind: input, shape index: {}]   ;;  %s2349_s5 = inlined_call_operand.vmem [shape: f32[1,128], index: 5, kind: input, shape index: {}]   ;;  %s2350_s6 = inlined_call_operand.vmem [shape: f32[32,16], index: 6, kind: input, shape index: {}]   ;;  %s2351_s7 = inlined_call_operand.vmem [shape: f32[1,16], index: 7, kind: input, shape index: {}]   ;;  %s2352_s8 = inlined_call_operand.hbm [shape: f32[8,8,16], index: 8, kind: output, shape index: {0}]   ;;  %s2353_s9 = inlined_call_operand.hbm [shape: f32[8,32], index: 9, kind: output, shape index: {1}]   ;;  %s2354_s10 = inlined_call_operand.hbm [shape: f32[8,32], index: 10, kind: output, shape index: {2}]  }
   0x1   :  { %2369 = sst [smem:[#allocation23_spill]] %s2345_s1 }
   0x2   :  { %2370 = sst [smem:[#allocation24_spill]] %s2346_s2 }
   0x3   :  { %2371 = sst [smem:[#allocation25_spill]] %s2352_s8 }
   0x4   :  { %2372 = sst [smem:[#allocation26_spill]] %s2354_s10 }
   0x5   :  { %16 = vsyncpa [#allocation7], 0 }
   0x6   :  { %18 = vsyncpa [#allocation7 + $0x1], 0 }
   0x7   :  { %19 = vsyncpa [#allocation10], 0 }
   0x8   :  { %20 = vsyncpa [#allocation8], 0 }
   0x9   :  { %22 = vsyncpa [#allocation8 + $0x1], 0 }
   0xa   :  { %23 = vsyncpa [#allocation14], 0  ;;  %s1921_s13 = smov 0   ;;  %s1923_s14 = smov 0  }
   0xb   :  { %s1925_s15 = smov 0   ;;  %s1927_s16 = smov 0  }
   0xc   :  { %s1929_s17 = smov 0   ;;  %s1931_s18 = smov 0  }
   0xd LB: > { %2373 = sst [smem:[#allocation20_spill]] %s1828_s13  ;;  %s1298_s19 = sadd.s32 4294967295, %s1848_s18   ;;  %s1848_s18 = sphi %s1931_s18, %s29_s18   ;;  %s1844_s17 = sphi %s1929_s17, %s2405_s17   ;;  %s1840_s16 = sphi %s1927_s16, %s2404_s16   ;;  %s1836_s15 = sphi %s1925_s15, %s2403_s15   ;;  %s1832_s14 = sphi %s1923_s14, %s2402_s14   ;;  %s1828_s13 = sphi %s1921_s13, %s2401_s13  }
   0xe   : > { %2374 = sst [smem:[#allocation21_spill]] %s1848_s18  ;;  %s1299_s20 = sadd.s32 4294967294, %s1848_s18  }
   0xf   : > { %p57_p0 = scmp.ne.s32.totalorder %s1836_s15, %s1832_s14  ;;  %p58_p1 = scmp.eq.s32.totalorder %s1848_s18, 0 }
  0x10   : > { %p63_p2 = scmp.ne.s32.totalorder %s1832_s14, %s1828_s13  ;;  %p1959_p3 = scmp.eq.s32.totalorder %s1298_s19, 0 }
  0x11   : > { %p1963_p4 = scmp.eq.s32.totalorder %s1298_s19, 1  ;;  %p1967_p5 = por %p58_p1, %p57_p0 }
  0x12   : > { %s2375_s22 = scalar_select %p1959_p3, 1, 0 }
  0x13   : > { %s2376_s23 = scalar_select %p1963_p4, 1, 0 }
  0x14   : > { %p252_p6 = scmp.eq.s32.totalorder %s1299_s20, 1  ;;  %p1973_p7 = por %p1959_p3, %p63_p2 }
  0x15   : > { %p1979_p8 = por %p1963_p4, %p57_p0  ;;  %p1300_p10 = scmp.ge.s32.totalorder %s1848_s18, 1 }
  0x16   : > { %s2378_s25 = scalar_select %p1973_p7, 1, 0 }
  0x17   : > { %s2379_s26 = scalar_select %p1979_p8, 1, 0 }
  0x18   : > { %p1983_p9 = por %p252_p6, %p63_p2  ;;  %p311_p11 = scmp.lt.s32.totalorder %s1848_s18, 3 }
  0x19   : > { %s1850_s29 = smov [#allocation9]   ;;  %p1518_p1 = scmp.lt.s32.totalorder %s1848_s18, 2 }
  0x1a   : > { %s2380_s27 = scalar_select %p1983_p9, 1, 0 }
  0x1b   : > { %p1990_p13 = pnand %p1300_p10, %p311_p11  ;;  %s326_s30 = sshll.u32 %s1850_s29, 4  ;;  %s327_s30 = int_to_ptr.vmem [resolvable:$true] %s326_s30 }
  0x1c   : > { %2381 = sst [smem:[#allocation22_spill]] %s2380_s27  ;;  %p1999_p8 = pnand %p1518_p1, %p1967_p5 }
  0x1d   : > { %s2382_s28 = scalar_select %p1990_p13, 1, 0 }
  0x1e   : > { %p1501_p0 = pneg %p1990_p13  ;;  %s1851_s12 = smov [#allocation11]  }
  0x1f   : > { %s2383_s11 = scalar_select %p1999_p8, 1, 0 }
  0x20   : > { %s339_s19 = sshll.u32 %s1851_s12, 4  ;;  %p2005_p2 = pnand %p1501_p0, %p1959_p3  ;;  %s2009_s19 = int_to_ptr.vmem [resolvable:$true] %s339_s19 }
  0x21   : > { %s2385_s1 = sld [smem:[#allocation23_spill]] }
  0x22   : > { %p1622_p6 = pneg %p2005_p2 }
  0x27   : > { %s1620_s18 = scalar_lea.hbm %s2385_s1, 128 }
  0x28   : > { %p1621_p5 = scmp.ne.s32.totalorder %s2385_s1, %s1620_s18  ;;  %p1627_p1 = scmp.lt.u32.totalorder %s1620_s18, %s2385_s1 }
  0x2a   : > { %p1623_p10 = pnand %p1622_p6, %p1621_p5 }
  0x2c   : > { %p1624_p11 = pneg %p1623_p10 }
  0x2e   : > { %p1629_p0 = pnand %p1627_p1, %p1624_p11 }
  0x30   : > { %1632 = shalt.err (!%p1629_p0)
}
  0x31   : > { %s1633_s10 = scalar_lea.vmem %s327_s30, 128  ;;  %p1641_p3 = scmp.lt.s32.totalorder %s327_s30, %s327_s30 }
  0x32   : > { %p1634_p12 = scmp.ne.s32.totalorder %s327_s30, %s1633_s10  ;;  %p1642_p7 = scmp.lt.s32.totalorder %s1633_s10, %s1633_s10 }
  0x34   : > { %p1636_p9 = pnand %p1634_p12, %p1622_p6  ;;  %p1643_p13 = por %p1642_p7, %p1641_p3 }
  0x36   : > { %p1637_p4 = pneg %p1636_p9 }
  0x38   : > { %p1644_p8 = pnand %p1643_p13, %p1637_p4 }
  0x3a   : > { %1647 = shalt.err (!%p1644_p8)
}
  0x3b   : > { %1504 = dma.hbm_to_vmem [thread:$0]  (!%p2005_p2), %s2385_s1, 128, %s327_s30, [#allocation10]  }
  0x3c   : > { %s2386_s2 = sld [smem:[#allocation24_spill]] }
  0x42   : > { %s1648_s29 = scalar_lea.hbm %s2386_s2, 128 }
  0x43   : > { %p1649_p9 = scmp.ne.s32.totalorder %s2386_s2, %s1648_s29  ;;  %p1655_p7 = scmp.lt.u32.totalorder %s1648_s29, %s2386_s2 }
  0x45   : > { %p1651_p3 = pnand %p1649_p9, %p1622_p6 }
  0x47   : > { %p1652_p4 = pneg %p1651_p3 }
  0x49   : > { %p1657_p8 = pnand %p1655_p7, %p1652_p4 }
  0x4b   : > { %1660 = shalt.err (!%p1657_p8)
}
  0x4c   : > { %s1661_s30 = scalar_lea.vmem %s2009_s19, 128  ;;  %p1669_p10 = scmp.lt.s32.totalorder %s2009_s19, %s2009_s19 }
  0x4d   : > { %p1662_p12 = scmp.ne.s32.totalorder %s2009_s19, %s1661_s30  ;;  %p1670_p11 = scmp.lt.s32.totalorder %s1661_s30, %s1661_s30 }
  0x4f   : > { %p1664_p13 = pnand %p1662_p12, %p1622_p6  ;;  %p1671_p1 = por %p1670_p11, %p1669_p10 }
  0x51   : > { %p1665_p5 = pneg %p1664_p13 }
  0x53   : > { %p1672_p0 = pnand %p1671_p1, %p1665_p5 }
  0x55   : > { %1675 = shalt.err (!%p1672_p0)
}
  0x56   : > { %1507 = dma.hbm_to_vmem [thread:$0]  (!%p2005_p2), %s2386_s2, 128, %s2009_s19, [#allocation10]  }
  0x57   : > { %s38_s27 = sadd.s32 1, %s1844_s17  ;;  %s365_s13 = sand.u32 1, %s1836_s15  }
  0x58   : > { %p39_p6 = scmp.ge.s32.totalorder %s38_s27, 2  ;;  %s1304_s18 = sshll.u32 %s365_s13, 5 }
  0x59   : > { %s1341_s29 = sshll.u32 %s1844_s17, 9  ;;  %s369_s19 = scalar_lea.vmem [#allocation6], %s1304_s18 }
  0x5a   : > { %s2407_s27 = smov (%p39_p6, %s38_s27), 0  ;;  %s2066_s12 = scalar_lea.hbm %s2344_s0, %s1341_s29 }
  0x5b   : > { %s45_s10 = ssub.s32 %s1844_s17, %s2407_s27  ;;  %s377_s30 = sshll.u32 %s369_s19, 4  ;;  %s2070_s30 = int_to_ptr.vmem [resolvable:$true] %s377_s30 }
  0x5c   : > { %p48_p2 = scmp.eq.s32.totalorder %s45_s10, 0  ;;  %s2387_s8 = sadd.s32 1, %s1836_s15 }
  0x5d   : > { %s2077_s1 = scalar_lea.sflag [#allocation7], %s365_s13  ;;  %s1676_s2 = scalar_lea.hbm %s2066_s12, 512 }
  0x5e   : > { %s2075_s21 = scalar_select %p48_p2, %s1836_s15, %s2387_s8  }
  0x5f   : > { %p1677_p9 = scmp.ne.s32.totalorder %s2066_s12, %s1676_s2  ;;  %p2388_p3 = scmp.ne.s32.totalorder %s2383_s11, 0 }
  0x60   : > { %s1681_s18 = scalar_lea.hbm %s2344_s0, 1024  ;;  %p1682_p12 = scmp.lt.u32.totalorder %s2066_s12, %s2344_s0 }
  0x61   : > { %p1678_p4 = pneg %p2388_p3  ;;  %p1683_p13 = scmp.lt.u32.totalorder %s1681_s18, %s1676_s2 }
  0x62   : > { %p1685_p10 = scmp.lt.u32.totalorder %s1676_s2, %s2066_s12 }
  0x63   : > { %p1679_p7 = pnand %p1678_p4, %p1677_p9  ;;  %p1684_p5 = por %p1683_p13, %p1682_p12 }
  0x65   : > { %p1680_p8 = pneg %p1679_p7  ;;  %p1686_p11 = por %p1685_p10, %p1684_p5 }
  0x67   : > { %p1687_p1 = pnand %p1686_p11, %p1680_p8 }
  0x69   : > { %1690 = shalt.err (!%p1687_p1)
}
  0x6a   : > { %s1691_s13 = scalar_lea.vmem %s2070_s30, 512  ;;  %s1852_s19 = smov [#allocation6]  }
  0x6b   : > { %p1692_p0 = scmp.ne.s32.totalorder %s2070_s30, %s1691_s13  ;;  %s1696_s8 = sshll.u32 %s1852_s19, 4  ;;  %s1697_s8 = int_to_ptr.vmem [resolvable:$false] %s1696_s8 }
  0x6c   : > { %s1698_s29 = scalar_lea.vmem %s1697_s8, 1024  ;;  %p1699_p9 = scmp.lt.s32.totalorder %s2070_s30, %s1697_s8 }
  0x6d   : > { %p1694_p6 = pnand %p1692_p0, %p1678_p4  ;;  %p1700_p7 = scmp.lt.s32.totalorder %s1698_s29, %s1691_s13 }
  0x6f   : > { %p1695_p2 = pneg %p1694_p6  ;;  %p1701_p12 = por %p1700_p7, %p1699_p9 }
  0x71   : > { %p1702_p13 = pnand %p1701_p12, %p1695_p2 }
  0x73   : > { %1705 = shalt.err (!%p1702_p13)
}
  0x74   : > { %s1853_s2 = smov 128   ;;  %s1854_s20 = smov 8  }
  0x75   : > { %1511 = dma.hbm_to_vmem [thread:$0]  (!%p2388_p3), %s2066_s12, 512, %s2070_s30, %s2077_s1, %s1853_s2, %s1853_s2, %s1854_s20  }
  0x76   : > { %p2389_p4 = scmp.ne.s32.totalorder %s2382_s28, 0 }
  0x77   : > { %s2108_s18 = sand.u32 (!%p2389_p4), 1, %s1832_s14   ;;  %p2390_p8 = scmp.ne.s32.totalorder (!%p2389_p4), %s2378_s25, 0 }
  0x78   : > { %389 = sbr.rel (%p2389_p4) target bundleno = 3264 (0xcc0), region = 52  ;;  %s1308_s24 = sshll.u32 (!%p2389_p4), %s2108_s18, 5 }
  0x79   : > { %s392_s10 = scalar_lea.sflag (!%p2389_p4), [#allocation7], %s2108_s18  ;;  %s2112_s13 = scalar_lea.vmem (!%p2389_p4), [#allocation6], %s1308_s24 }
  0x7f   : > { %1811 = dma.done.wait (%p2390_p8), %s392_s10, 512  }
  0x80   : > { %1813 = vsyncadd (%p2390_p8), %s392_s10, 4294966784  ;;  %p2391_p3 = scmp.ne.s32.totalorder %s2375_s22, 0 }
  0x82   : > { %1815 = dma.done.wait (%p2391_p3), [#allocation10], 256  }
  0x83   : > { %1817 = vsyncadd (%p2391_p3), [#allocation10], 4294967040  ;;  %s2122_s1 = scalar_lea.vmem [#allocation12], %s1308_s24  ;;  %p1312_p5 = scmp.ne.s32.totalorder %s1840_s16, 0 }
  0x84   : > { %v446_v0 = vld [vmem:[#allocation9] sm:$0xff] (!%p1312_p5)  ;;  %vm447_vm0 = vcmask (!%p1312_p5), 261120   ;;  %v449_v1 = vld [vmem:[#allocation11] sm:$0xff] (!%p1312_p5) }
  0x85   : > { %445 = sbr.rel (%p1312_p5) target bundleno = 140 (0x8c), region = 68  ;;  %448 = vst.msk [vmem:[#allocation4] sm:$0xff] (!%p1312_p5), %vm447_vm0, %v446_v0  ;;  %450 = vst.msk [vmem:[#allocation5] sm:$0xff] (!%p1312_p5), %vm447_vm0, %v449_v1 }
  0x8c PF: > { %v455_v2 = vld [vmem:[%s2347_s3] sm:$0xff]  ;;  %v456_v3 = vld [vmem:[%s2347_s3 + $0x8] sm:$0xff]  ;;  %vm464_vm1 = vcmask 130048   ;;  %v1855_v5 = vmov 0.0|0.0   ;;  %v451_v8 = vld [vmem:[%s2112_s13] sm:$0xff]  ;;  %vm1856_vm2 = vmmov 0  }
  0x8d   : > { %v566_v4 = vld [vmem:[%s2348_s4] sm:$0xff]  ;;  %1449 = vmatprep.subr.bf16.mxu1 %v1855_v5  ;;  %v1445_v6 = vpack.c.bf16 %v456_v3, %v455_v2  ;;  %v567_v7 = vld [vmem:[%s2348_s4 + $0x8] sm:$0xff]  ;;  %1381 = vmatprep.mubr.msk.f32.mxu0 %vm464_vm1, %v451_v8  ;;  %v568_v10 = vld [vmem:[%s2348_s4 + $0x10] sm:$0xff]  ;;  %v1857_v12 = vmov 0.0   ;;  %vm573_vm3 = vcmask 261120   ;;  %s1858_s25 = smov 32  }
  0x8e   : > { %v2139_v9 = vpack.c.bf16 %v567_v7, %v566_v4  ;;  %v569_v11 = vld [vmem:[%s2348_s4 + $0x18] sm:$0xff]  ;;  %1395 = vmatprep.mubr.msk.f32.mxu1 %vm1856_vm2, %v1857_v12  ;;  %v570_v15 = vld [vmem:[#allocation4] sm:$0xff]  ;;  %v571_v24 = vld [vmem:[#allocation5] sm:$0xff]  ;;  %s1859_s11 = smov 64   ;;  %s1860_s10 = smov 96  }
  0x8f   : > { %1446 = vmatprep.subr.bf16.mxu0 %v1445_v6  ;;  %v452_v13 = vld [vmem:[%s2112_s13 + $0x8] sm:$0xff]  ;;  %v1453_v14 = vpack.c.bf16 %v569_v11, %v568_v10  ;;  %v2167_v16 = vld [vmem:[%s2349_s5] ss:$0 sm:$0xff]  ;;  %v454_v36 = vld [vmem:[%s2112_s13 + $0x18] sm:$0xff]  ;;  %p1331_p10 = scmp.ne.s32.totalorder %s1840_s16, 1 }
  0x90   : > { %1451 = vmatpush3.bf16.msra.mxu1 %v2139_v9  ;;  %1448 = vmatpush3.bf16.msra.mxu0 %v1445_v6  ;;  %v453_v35 = vld [vmem:[%s2112_s13 + $0x10] sm:$0xff]  ;;  %v1007_v59 = vld [vmem:[%s2350_s6 + $0x8] sm:$0xff]  ;;  %v1008_v63 = vld [vmem:[%s2350_s6 + $0x10] sm:$0xff] }
  0x91   : > { %1452 = vmatprep.subr.bf16.mxu1 %v1855_v5  ;;  %1455 = vmatprep.subr.bf16.mxu0 %v1855_v5  ;;  %v1006_v58 = vld [vmem:[%s2350_s6] sm:$0xff]  ;;  %v1009_v0 = vld [vmem:[%s2350_s6 + $0x18] sm:$0xff] }
  0x92   : > { %v1473_v60 = vpack.c.bf16 %v1007_v59, %v1006_v58  ;;  %v1477_v1 = vpack.c.bf16 %v1009_v0, %v1008_v63 }
  0x93   : > { %1382 = vmatmul.mubr.msk.f32.vlgmr.msra.gmra.mrb[0].mxu0 %vm464_vm1, %v452_v13 }
  0x94   : > { %1454 = vmatpush3.bf16.msra.mxu1 %v1453_v14  ;;  %1457 = vmatpush3.bf16.msra.mxu0 %v2139_v9 }
  0x95   : > { %1458 = vmatprep.subr.bf16.mxu0 %v1855_v5  ;;  %1461 = vmatprep.subr.bf16.mxu1 %v1855_v5 }
  0x96   : > { %1384 = vmatprep.mubr.msk.f32.mxu0 %vm464_vm1, %v453_v35 }
  0x97   : > { %1396 = vmatmul.mubr.msk.f32.vlgmr.msra.gmra.mrb[0].mxu1 %vm573_vm3, %v570_v15  ;;  %1385 = vmatmul.mubr.msk.f32.gmra.mrb[2].mxu0 %vm464_vm1, %v454_v36 }
  0x98   : > { %1460 = vmatpush3.bf16.msra.mxu0 %v1453_v14  ;;  %1463 = vmatpush3.bf16.msra.mxu1 %v2139_v9 }
  0x99   : > { %1464 = vmatprep.subr.bf16.mxu1 %v1855_v5  ;;  %1417 = vmatprep.mubr.msk.f32.mxu1 %vm1856_vm2, %v1857_v12 }
  0x9a   : > { %1467 = vmatprep.subr.bf16.mxu0 %v1855_v5  ;;  %1406 = vmatprep.mubr.msk.f32.mxu0 %vm1856_vm2, %v1857_v12 }
  0x9c   : > { %1466 = vmatpush3.bf16.msra.mxu1 %v1453_v14 }
  0x9d   : > { %1474 = vmatprep.subr.bf16.mxu1 %v1473_v60 }
 0x166   : > { %v1383_v17 = vpop.f32.mrb[0].mxu0 }
 0x167   : > { %v543_v18 = vpop.f32.mrb[1].mxu0  ;;  %v549_v43 = vadd.f32 %v1383_v17, %v2167_v16 }
 0x168   : > { %v544_v19 = vadd.f32 %v2167_v16, %v543_v18 }
 0x16a   : > { %v643_v20 = vpop.f32.mrb[0].mxu1  ;;  %v2181_v40 = vpop.f32.mrb[2].mxu0 }
 0x16b   : > { %v647_v21 = vadd.f32 %v643_v20, %v544_v19  ;;  %v1397_v22 = vpop.f32.mrb[1].mxu1  ;;  %v553_v41 = vpop.f32.mrb[3].mxu0 }
 0x16d   : > { %1588 = vtanh.f32 %v647_v21  ;;  %v1319_v25 = vmul.f32 -1.442695, %v647_v21 }
 0x16f   : > { %1590 = vpow2.f32 %v1319_v25 }
 0x177   : > { %v1589_v23 = vpop.eup %1588 }
 0x178   : > { %661 = vrot.lane.b32.xlu0 %v1589_v23, %s1858_s25 }
 0x179   : > { %v1591_v26 = vpop.eup %1590 }
 0x17a   : > { %v651_v27 = vadd.f32 1.0, %v1591_v26 }
 0x17c   : > { %656 = vrot.lane.b32.xlu0 %v571_v24, %s1858_s25  ;;  %1592 = vrcp.f32 %v651_v27 }
 0x186   : > { %v1593_v28 = vpop.eup %1592 }
 0x1ea   : > { %v662_v29 = vpop.permute.xlu0 %661 }
 0x1eb   : > { %v664_v30 = vmul.f32 %v1593_v28, %v662_v29 }
 0x1ed   : > { %666 = vrot.lane.b32.xlu1 %v664_v30, %s1858_s25  ;;  %v559_v30 = vadd.f32 %v2181_v40, %v2167_v16 }
 0x1ee   : > { %v657_v31 = vpop.permute.xlu0 %656 }
 0x1ef   : > { %v659_v32 = vmul.f32 %v1593_v28, %v657_v31 }
 0x25f   : > { %v667_v33 = vpop.permute.xlu1 %666 }
 0x260   : > { %v669_v34 = vadd.f32 %v667_v33, %v659_v32 }
 0x262   : > { %1594 = vtanh.f32 %v669_v34 }
 0x26c   : > { %v1595_v37 = vpop.eup %1594 }
 0x26d   : > { %672 = vrot.lane.b32.xlu1 %v1595_v37, %s1858_s25 }
 0x2df   : > { %v673_v38 = vpop.permute.xlu1 %672 }
 0x2e0   : > { %v675_v39 = vmul.f32 %v1593_v28, %v673_v38 }
 0x2e2   : > { %677 = vrot.lane.b32.xlu0 %v675_v39, %s1859_s11 }
 0x354   : > { %v678_v42 = vpop.permute.xlu0 %677 }
 0x355   : > { %680 = vst.msk [vmem:[#allocation3] sm:$0xff] %vm573_vm3, %v678_v42  ;;  %1407 = vmatmul.mubr.msk.f32.vlgmr.msra.gmra.mrb[4].mxu0 %vm573_vm3, %v678_v42 }
 0x356   : > { %1469 = vmatpush3.bf16.msra.mxu0 %v2139_v9  ;;  %1428 = vmatprep.mubr.msk.f32.mxu0 %vm1856_vm2, %v1857_v12  ;;  %v2214_v9 = vld [vmem:[%s2351_s7] ss:$0 sm:$0xff] }
 0x357   : > { %1470 = vmatprep.subr.bf16.mxu0 %v1855_v5  ;;  %v554_v5 = vadd.f32 %v2167_v16, %v553_v41 }
 0x35a   : > { %1472 = vmatpush3.bf16.msra.mxu0 %v1453_v14 }
 0x35c   : > { %v1002_v3 = vld [vmem:[#allocation3] sm:$0xff] }
 0x428   : > { %v751_v44 = vpop.f32.mrb[4].mxu0 }
 0x429   : > { %v755_v45 = vadd.f32 %v751_v44, %v549_v43  ;;  %v1408_v46 = vpop.f32.mrb[5].mxu0 }
 0x42b   : > { %1596 = vtanh.f32 %v755_v45  ;;  %v1321_v48 = vmul.f32 -1.442695, %v755_v45 }
 0x42d   : > { %1598 = vpow2.f32 %v1321_v48 }
 0x435   : > { %v1597_v47 = vpop.eup %1596 }
 0x436   : > { %765 = vrot.lane.b32.xlu1 %v1597_v47, %s1858_s25 }
 0x437   : > { %v1599_v49 = vpop.eup %1598 }
 0x438   : > { %v759_v50 = vadd.f32 1.0, %v1599_v49 }
 0x43a   : > { %1600 = vrcp.f32 %v759_v50 }
 0x444   : > { %v1601_v51 = vpop.eup %1600 }
 0x445   : > { %v763_v54 = vmul.f32 %v1601_v51, %v669_v34 }
 0x4a8   : > { %v766_v52 = vpop.permute.xlu1 %765 }
 0x4a9   : > { %v768_v53 = vmul.f32 %v1601_v51, %v766_v52 }
 0x4ab   : > { %770 = vrot.lane.b32.xlu0 %v768_v53, %s1858_s25 }
 0x51d   : > { %v771_v55 = vpop.permute.xlu0 %770 }
 0x51e   : > { %v773_v56 = vadd.f32 %v771_v55, %v763_v54 }
 0x520   : > { %1602 = vtanh.f32 %v773_v56 }
 0x52a   : > { %v1603_v57 = vpop.eup %1602 }
 0x52b   : > { %776 = vrot.lane.b32.xlu1 %v1603_v57, %s1858_s25 }
 0x59d   : > { %v777_v61 = vpop.permute.xlu1 %776 }
 0x59e   : > { %v779_v62 = vmul.f32 %v1601_v51, %v777_v61 }
 0x5a0   : > { %781 = vrot.lane.b32.xlu0 %v779_v62, %s1859_s11 }
 0x612   : > { %v782_v2 = vpop.permute.xlu0 %781 }
 0x613   : > { %785 = vst.msk [vmem:[#allocation3 + $0x8] sm:$0xff] %vm573_vm3, %v782_v2  ;;  %1418 = vmatmul.mubr.msk.f32.vlgmr.msra.gmra.mrb[2].mxu1 %vm573_vm3, %v782_v2 }
 0x614   : > { %1476 = vmatpush3.bf16.msra.mxu1 %v1473_v60  ;;  %1439 = vmatprep.mubr.msk.f32.mxu1 %vm573_vm3, %v1002_v3 }
 0x615   : > { %1478 = vmatprep.subr.bf16.mxu1 %v1477_v1 }
 0x618   : > { %1480 = vmatpush3.bf16.msra.mxu1 %v1477_v1 }
 0x61a   : > { %v1003_v4 = vld [vmem:[#allocation3 + $0x8] sm:$0xff] }
 0x61b   : > { %1440 = vmatmul.mubr.msk.f32.vlgmr.msra.gmra.mrb[4].mxu1 %vm573_vm3, %v1003_v4 }
 0x6e6   : > { %v856_v6 = vpop.f32.mrb[2].mxu1 }
 0x6e7   : > { %v860_v7 = vadd.f32 %v856_v6, %v554_v5  ;;  %v1419_v8 = vpop.f32.mrb[3].mxu1 }
 0x6e9   : > { %1604 = vtanh.f32 %v860_v7  ;;  %v1323_v15 = vmul.f32 -1.442695, %v860_v7 }
 0x6eb   : > { %1606 = vpow2.f32 %v1323_v15 }
 0x6ee   : > { %v1441_v10 = vpop.f32.mrb[4].mxu1 }
 0x6ef   : > { %v1101_v11 = vadd.f32 %v1441_v10, %v2214_v9  ;;  %v1095_v12 = vpop.f32.mrb[5].mxu1 }
 0x6f0   : > { %v1096_v13 = vadd.f32 %v2214_v9, %v1095_v12 }
 0x6f1   : > { %1115 = vst.msk [vmem:[%s2122_s1 + $0x8] sm:$0xff] %vm464_vm1, %v1101_v11 }
 0x6f2   : > { %1114 = vst.msk [vmem:[%s2122_s1] sm:$0xff] %vm464_vm1, %v1096_v13 }
 0x6f3   : > { %v1605_v14 = vpop.eup %1604 }
 0x6f4   : > { %870 = vrot.lane.b32.xlu1 %v1605_v14, %s1858_s25 }
 0x6f5   : > { %v1607_v17 = vpop.eup %1606 }
 0x6f6   : > { %v864_v18 = vadd.f32 1.0, %v1607_v17 }
 0x6f8   : > { %1608 = vrcp.f32 %v864_v18 }
 0x702   : > { %v1609_v19 = vpop.eup %1608 }
 0x703   : > { %v868_v22 = vmul.f32 %v1609_v19, %v773_v56 }
 0x766   : > { %v871_v20 = vpop.permute.xlu1 %870 }
 0x767   : > { %v873_v21 = vmul.f32 %v1609_v19, %v871_v20 }
 0x769   : > { %875 = vrot.lane.b32.xlu0 %v873_v21, %s1858_s25 }
 0x7db   : > { %v876_v23 = vpop.permute.xlu0 %875 }
 0x7dc   : > { %v878_v24 = vadd.f32 %v876_v23, %v868_v22 }
 0x7de   : > { %1610 = vtanh.f32 %v878_v24 }
 0x7e8   : > { %v1611_v25 = vpop.eup %1610 }
 0x7e9   : > { %881 = vrot.lane.b32.xlu1 %v1611_v25, %s1858_s25 }
 0x85b   : > { %v882_v26 = vpop.permute.xlu1 %881 }
 0x85c   : > { %v884_v27 = vmul.f32 %v1609_v19, %v882_v26 }
 0x85e   : > { %886 = vrot.lane.b32.xlu0 %v884_v27, %s1859_s11 }
 0x8d0   : > { %v887_v28 = vpop.permute.xlu0 %886 }
 0x8d1   : > { %890 = vst.msk [vmem:[#allocation3 + $0x10] sm:$0xff] %vm573_vm3, %v887_v28  ;;  %1429 = vmatmul.mubr.msk.f32.vlgmr.msra.gmra.mrb[6].mxu0 %vm573_vm3, %v887_v28 }
 0x8d8   : > { %v1004_v29 = vld [vmem:[#allocation3 + $0x10] sm:$0xff] }
 0x8d9   : > { %1442 = vmatprep.mubr.msk.f32.mxu1 %vm573_vm3, %v1004_v29 }
 0x9a4   : > { %v961_v31 = vpop.f32.mrb[6].mxu0 }
 0x9a5   : > { %v965_v32 = vadd.f32 %v961_v31, %v559_v30  ;;  %v1430_v33 = vpop.f32.mrb[7].mxu0 }
 0x9a7   : > { %1612 = vtanh.f32 %v965_v32  ;;  %v1325_v35 = vmul.f32 -1.442695, %v965_v32 }
 0x9a9   : > { %1614 = vpow2.f32 %v1325_v35 }
 0x9b1   : > { %v1613_v34 = vpop.eup %1612 }
 0x9b2   : > { %975 = vrot.lane.b32.xlu1 %v1613_v34, %s1858_s25 }
 0x9b3   : > { %v1615_v36 = vpop.eup %1614 }
 0x9b4   : > { %v969_v37 = vadd.f32 1.0, %v1615_v36 }
 0x9b6   : > { %1616 = vrcp.f32 %v969_v37 }
 0x9c0   : > { %v1617_v38 = vpop.eup %1616 }
 0x9c1   : > { %v973_v42 = vmul.f32 %v1617_v38, %v878_v24 }
 0xa24   : > { %v976_v39 = vpop.permute.xlu1 %975 }
 0xa25   : > { %v978_v41 = vmul.f32 %v1617_v38, %v976_v39 }
 0xa27   : > { %980 = vrot.lane.b32.xlu0 %v978_v41, %s1858_s25 }
 0xa99   : > { %v981_v43 = vpop.permute.xlu0 %980 }
 0xa9a   : > { %v983_v16 = vadd.f32 %v981_v43, %v973_v42 }
 0xa9c   : > { %1618 = vtanh.f32 %v983_v16 }
 0xaa6   : > { %v1619_v40 = vpop.eup %1618 }
 0xaa7   : > { %986 = vrot.lane.b32.xlu1 %v1619_v40, %s1858_s25 }
 0xaab   : > { %998 = vrot.lane.b32.xlu1 %v983_v16, %s1860_s10 }
 0xb19   : > { %v987_v44 = vpop.permute.xlu1 %986 }
 0xb1a   : > { %v989_v45 = vmul.f32 %v1617_v38, %v987_v44 }
 0xb1c   : > { %991 = vrot.lane.b32.xlu0 %v989_v45, %s1859_s11 }
 0xb1d   : > { %v999_v46 = vpop.permute.xlu1 %998 }
 0xb1e   : > { %1001 = vst.msk [vmem:[#allocation5] sm:$0xff] %vm573_vm3, %v999_v46  ;;  %1123 = vst.msk [vmem:[#allocation15] sm:$0xff] (!%p1331_p10), %vm573_vm3, %v999_v46 }
 0xb8e   : > { %v992_v47 = vpop.permute.xlu0 %991 }
 0xb8f   : > { %995 = vst.msk [vmem:[#allocation3 + $0x18] sm:$0xff] %vm573_vm3, %v992_v47  ;;  %996 = vst.msk [vmem:[#allocation4] sm:$0xff] %vm573_vm3, %v992_v47 }
 0xb90   : > { %1122 = vst.msk [vmem:[#allocation13] sm:$0xff] (!%p1331_p10), %vm573_vm3, %v992_v47 }
 0xb96   : > { %v1005_v48 = vld [vmem:[#allocation3 + $0x18] sm:$0xff] }
 0xb97   : > { %1443 = vmatmul.mubr.msk.f32.gmra.mrb[6].mxu1 %vm573_vm3, %v1005_v48 }
 0xc68   : > { %1121 = sbr.rel (%p1331_p10) target bundleno = 3183 (0xc6f), region = 72 }
 0xc6a   : > { %v1444_v49 = vpop.f32.mrb[6].mxu1 }
 0xc6b   : > { %v1111_v50 = vadd.f32 %v1444_v49, %v2214_v9  ;;  %v1105_v51 = vpop.f32.mrb[7].mxu1 }
 0xc6c   : > { %v1106_v52 = vadd.f32 %v2214_v9, %v1105_v51 }
 0xc6d   : > { %1117 = vst.msk [vmem:[%s2122_s1 + $0x18] sm:$0xff] %vm464_vm1, %v1111_v50 }
 0xc6e   : > { %1116 = vst.msk [vmem:[%s2122_s1 + $0x10] sm:$0xff] %vm464_vm1, %v1106_v52 }
 0xc6f PF: > { %s1861_s28 = smov [#allocation13]   ;;  %s1342_s11 = sshll.u32 %s1840_s16, 9 }
 0xc70   : > { %s1155_s25 = sshll.u32 %s1861_s28, 4  ;;  %p2392_p1 = scmp.ne.s32.totalorder %s2376_s23, 0  ;;  %s1156_s25 = int_to_ptr.vmem [resolvable:$true] %s1155_s25 }
 0xc71   : > { %s1706_s13 = scalar_lea.vmem %s1156_s25, 128  ;;  %p1713_p2 = scmp.lt.s32.totalorder %s1156_s25, %s1156_s25 }
 0xc72   : > { %p1707_p11 = scmp.ne.s32.totalorder %s1156_s25, %s1706_s13  ;;  %p1714_p9 = scmp.lt.s32.totalorder %s1706_s13, %s1706_s13 }
 0xc74   : > { %p1708_p0 = pnand %p1707_p11, %p2392_p1  ;;  %p1715_p7 = por %p1714_p9, %p1713_p2 }
 0xc76   : > { %p1709_p6 = pneg %p1708_p0 }
 0xc78   : > { %p1716_p12 = pnand %p1715_p7, %p1709_p6 }
 0xc7a   : > { %1719 = shalt.err (!%p1716_p12)
}
 0xc7b   : > { %s1720_s30 = scalar_lea.hbm %s2353_s9, 128 }
 0xc7c   : > { %p1721_p13 = scmp.ne.s32.totalorder %s2353_s9, %s1720_s30  ;;  %p1726_p3 = scmp.lt.u32.totalorder %s1720_s30, %s2353_s9 }
 0xc7e   : > { %p1722_p4 = pnand %p1721_p13, %p2392_p1 }
 0xc80   : > { %p1723_p8 = pneg %p1722_p4 }
 0xc82   : > { %p1728_p5 = pnand %p1726_p3, %p1723_p8 }
 0xc84   : > { %1731 = shalt.err (!%p1728_p5)
}
 0xc85   : > { %1493 = dma.vmem_to_hbm [thread:$0]  (%p2392_p1), %s1156_s25, 128, %s2353_s9, [#allocation14]  }
 0xc86   : > { %s2393_s28 = sld [smem:[#allocation25_spill]]  ;;  %s1139_s12 = sshll.u32 %s2122_s1, 4  ;;  %s2273_s12 = int_to_ptr.vmem [resolvable:$true] %s1139_s12 }
 0xc87   : > { %s1125_s22 = scalar_lea.sflag [#allocation8], %s2108_s18  ;;  %s1732_s30 = scalar_lea.vmem %s2273_s12, 512 }
 0xc88   : > { %p1733_p10 = scmp.ne.s32.totalorder %s2273_s12, %s1732_s30  ;;  %p2394_p11 = scmp.ne.s32.totalorder %s2379_s26, 0 }
 0xc89   : > { %s1862_s19 = smov [#allocation12]  }
 0xc8a   : > { %p1734_p0 = pnand %p1733_p10, %p2394_p11  ;;  %s1736_s8 = sshll.u32 %s1862_s19, 4  ;;  %s1737_s8 = int_to_ptr.vmem [resolvable:$false] %s1736_s8 }
 0xc8b   : > { %s1738_s25 = scalar_lea.vmem %s1737_s8, 1024  ;;  %p1739_p2 = scmp.lt.s32.totalorder %s2273_s12, %s1737_s8 }
 0xc8c   : > { %s2270_s13 = scalar_lea.hbm %s2393_s28, %s1342_s11  ;;  %p1735_p6 = pneg %p1734_p0 }
 0xc8d   : > { %p1740_p9 = scmp.lt.s32.totalorder %s1738_s25, %s1732_s30 }
 0xc8f   : > { %p1741_p7 = por %p1740_p9, %p1739_p2 }
 0xc91   : > { %p1742_p12 = pnand %p1741_p7, %p1735_p6 }
 0xc93   : > { %1745 = shalt.err (!%p1742_p12)
}
 0xc94   : > { %s1746_s1 = scalar_lea.hbm %s2270_s13, 512  ;;  %s1750_s29 = scalar_lea.hbm %s2393_s28, 1024 }
 0xc95   : > { %p1747_p13 = scmp.ne.s32.totalorder %s2270_s13, %s1746_s1  ;;  %p1751_p3 = scmp.lt.u32.totalorder %s2270_s13, %s2393_s28 }
 0xc96   : > { %p1752_p5 = scmp.lt.u32.totalorder %s1750_s29, %s1746_s1  ;;  %p1754_p0 = scmp.lt.u32.totalorder %s1746_s1, %s2270_s13 }
 0xc97   : > { %p1748_p4 = pnand %p1747_p13, %p2394_p11 }
 0xc98   : > { %p1753_p10 = por %p1752_p5, %p1751_p3 }
 0xc99   : > { %p1749_p8 = pneg %p1748_p4 }
 0xc9a   : > { %p1755_p6 = por %p1754_p0, %p1753_p10 }
 0xc9c   : > { %p1756_p2 = pnand %p1755_p6, %p1749_p8 }
 0xc9e   : > { %1759 = shalt.err (!%p1756_p2)
}
 0xc9f   : > { %s1863_s24 = smov 128   ;;  %s1864_s10 = smov 8  }
 0xca0   : > { %1491 = dma.vmem_to_hbm [thread:$0]  (%p2394_p11), %s2273_s12, 512, %s2270_s13, %s1125_s22, %s1863_s24, %s1863_s24, %s1864_s10  }
 0xca1   : > { %s1865_s30 = smov [#allocation15]  }
 0xca2   : > { %s1168_s19 = sshll.u32 %s1865_s30, 4  ;;  %s1169_s19 = int_to_ptr.vmem [resolvable:$true] %s1168_s19 }
 0xca3   : > { %s1760_s8 = scalar_lea.vmem %s1169_s19, 128  ;;  %p1767_p13 = scmp.lt.s32.totalorder %s1169_s19, %s1169_s19 }
 0xca4   : > { %p1761_p9 = scmp.ne.s32.totalorder %s1169_s19, %s1760_s8  ;;  %p1768_p4 = scmp.lt.s32.totalorder %s1760_s8, %s1760_s8 }
 0xca6   : > { %p1762_p7 = pnand %p1761_p9, %p2392_p1  ;;  %p1769_p8 = por %p1768_p4, %p1767_p13 }
 0xca8   : > { %p1763_p12 = pneg %p1762_p7 }
 0xcaa   : > { %p1770_p3 = pnand %p1769_p8, %p1763_p12 }
 0xcac   : > { %1773 = shalt.err (!%p1770_p3)
}
 0xcad   : > { %s2395_s11 = sld [smem:[#allocation26_spill]] }
 0xcb3   : > { %s1774_s26 = scalar_lea.hbm %s2395_s11, 128 }
 0xcb4   : > { %p1775_p11 = scmp.ne.s32.totalorder %s2395_s11, %s1774_s26  ;;  %p1780_p0 = scmp.lt.u32.totalorder %s1774_s26, %s2395_s11 }
 0xcb6   : > { %p1776_p5 = pnand %p1775_p11, %p2392_p1 }
 0xcb8   : > { %p1777_p10 = pneg %p1776_p5 }
 0xcba   : > { %p1782_p6 = pnand %p1780_p0, %p1777_p10 }
 0xcbc   : > { %1785 = shalt.err (!%p1782_p6)
}
 0xcbd   : > { %1495 = dma.vmem_to_hbm [thread:$0]  (%p2392_p1), %s1169_s19, 128, %s2395_s11, [#allocation14]  }
 0xcbe   : > { %1819 = dma.done.wait (%p2392_p1), [#allocation14], 256  }
 0xcbf   : > { %1821 = vsyncadd (%p2392_p1), [#allocation14], 4294967040 }
 0xcc0 PF: > { %s2396_s2 = sld [smem:[#allocation20_spill]]  ;;  %s2397_s20 = sld [smem:[#allocation22_spill]] }
 0xcc1   : > { %s2398_s24 = sld [smem:[#allocation21_spill]] }
 0xcc6   : > { %s1188_s10 = sand.u32 1, %s2396_s2   ;;  %p2399_p2 = scmp.ne.s32.totalorder %s2397_s20, 0 }
 0xcc7   : > { %p2400_p9 = scmp.ge.s32.totalorder %s2398_s24, 2  ;;  %s1189_s30 = scalar_lea.sflag [#allocation8], %s1188_s10 }
 0xcc9   : > { %p1513_p7 = pnand %p2400_p9, %p2399_p2 }
 0xccb   : > { %1823 = dma.done.wait (!%p1513_p7), %s1189_s30, 512  }
 0xccc   : > { %1825 = vsyncadd (!%p1513_p7), %s1189_s30, 4294966784  ;;  %s29_s18 = sadd.s32 1, %s2398_s24   ;;  %s2401_s13 = smov %s1832_s14 }
 0xccd   : > { %p26_p12 = scmp.ge.s32.totalorder %s29_s18, 4   ;;  %s2402_s14 = smov %s1836_s15 }
 0xcce   : > { %s2403_s15 = smov %s2075_s21  ;;  %s2404_s16 = smov %s1844_s17 }
 0xccf   : > { %s2405_s17 = smov %s2407_s27  ;;  %28 = sbr.rel (!%p26_p12) target bundleno = 13 (0xd), region = 139 }
 0xcd6   :  { %1194 = vsyncpa [#allocation7], 1 }
 0xcd7   :  { %1196 = vsyncpa [#allocation7 + $0x1], 1 }
 0xcd8   :  { %1197 = vsyncpa [#allocation10], 1 }
 0xcd9   :  { %1198 = vsyncpa [#allocation8], 1 }
 0xcda   :  { %1200 = vsyncpa [#allocation8 + $0x1], 1 }
 0xcdb   :  { %1201 = vsyncpa [#allocation14], 1 }

</bundles_post_ra>
